<compile_context>
chip_gen: v7x
topology: tpu7x:2x2x1
jax: 0.10.0
libtpu: 0.0.40
codegen_flags: <defaults>
</compile_context>

<pallas_src>
import jax
import jax.numpy as jnp
from jax.experimental import pallas as pl
from jax.experimental.pallas import tpu as pltpu


def _round_up(x, m):
    return (x + m - 1) // m * m


def bigram_loss_kernel(idx_ref, tgt_ref, table_ref, logits_ref, rowloss_ref):
    TN, Vp = logits_ref.shape
    idx = idx_ref[...]                                            # (TN, 1) int32
    tgt = tgt_ref[...]                                            # (TN, 1) int32

    col = jax.lax.broadcasted_iota(jnp.int32, (TN, Vp), 1)        # (TN, Vp)

    # Embedding lookup as one-hot @ table on the MXU (exact: one 1.0 per row).
    onehot = (col == idx).astype(jnp.float32)                     # (TN, Vp)
    logits = jnp.dot(onehot, table_ref[...],
                     preferred_element_type=jnp.float32)          # (TN, Vp)
    logits_ref[...] = logits

    # Per-row cross entropy: logsumexp(logits) - logits[target].
    # Padded columns hold -1e30, so exp(pad - m) underflows to 0 and the
    # logsumexp over Vp columns equals the logsumexp over the true V columns.
    m = jnp.max(logits, axis=-1, keepdims=True)                   # (TN, 1)
    lse = m + jnp.log(jnp.sum(jnp.exp(logits - m), axis=-1, keepdims=True))
    tgt_logit = jnp.sum(jnp.where(col == tgt, logits, 0.0),
                        axis=-1, keepdims=True)                   # (TN, 1)
    rowloss_ref[...] = lse - tgt_logit


def bigram_logits_kernel(idx_ref, table_ref, logits_ref):
    # Inference path: embedding gather only, no cross-entropy work.
    TN, Vp = logits_ref.shape
    idx = idx_ref[...]                                            # (TN, 1) int32
    col = jax.lax.broadcasted_iota(jnp.int32, (TN, Vp), 1)        # (TN, Vp)
    onehot = (col == idx).astype(jnp.float32)
    logits_ref[...] = jnp.dot(onehot, table_ref[...],
                              preferred_element_type=jnp.float32)


def bigram_forward(idx, table, targets=None, *, tile_rows=512):
    """Pallas equivalent of BigramLanguageModel.forward."""
    B, T = idx.shape
    V = table.shape[0]
    N = B * T

    # Lane-dense vocab padding and row tiling.
    V_pad = _round_up(V, 128)
    TN = tile_rows if N >= tile_rows else _round_up(N, 8)
    N_pad = _round_up(N, TN)
    num_tiles = N_pad // TN

    # Pad the table: real block upper-left, padded columns at -1e30 so the
    # logsumexp ignores them.  Padded rows are never selected (idx < V).
    table_pad = jnp.zeros((V_pad, V_pad), jnp.float32)
    table_pad = table_pad.at[:V, :V].set(table.astype(jnp.float32))
    if V_pad > V:
        table_pad = table_pad.at[:, V:].set(jnp.float32(-1e30))

    # Pad token ids with 0 (a valid row); padded rows are sliced off below.
    idx_flat = jnp.zeros((N_pad, 1), jnp.int32)
    idx_flat = idx_flat.at[:N, 0].set(idx.reshape(N).astype(jnp.int32))

    compiler_params = pltpu.CompilerParams(
        dimension_semantics=("parallel",))

    if targets is None:
        logits_pad = pl.pallas_call(
            bigram_logits_kernel,
            out_shape=jax.ShapeDtypeStruct((N_pad, V_pad), jnp.float32),
            grid=(num_tiles,),
            in_specs=[
                pl.BlockSpec((TN, 1), lambda i: (i, 0)),
                pl.BlockSpec((V_pad, V_pad), lambda i: (0, 0)),  # VMEM-resident
            ],
            out_specs=pl.BlockSpec((TN, V_pad), lambda i: (i, 0)),
            compiler_params=compiler_params,
        )(idx_flat, table_pad)
        logits = logits_pad[:N, :V].reshape(B, T, V)
        return logits, None

    tgt_flat = jnp.zeros((N_pad, 1), jnp.int32)
    tgt_flat = tgt_flat.at[:N, 0].set(targets.reshape(N).astype(jnp.int32))

    logits_pad, row_loss = pl.pallas_call(
        bigram_loss_kernel,
        out_shape=(
            jax.ShapeDtypeStruct((N_pad, V_pad), jnp.float32),
            jax.ShapeDtypeStruct((N_pad, 1), jnp.float32),
        ),
        grid=(num_tiles,),
        in_specs=[
            pl.BlockSpec((TN, 1), lambda i: (i, 0)),
            pl.BlockSpec((TN, 1), lambda i: (i, 0)),
            pl.BlockSpec((V_pad, V_pad), lambda i: (0, 0)),      # VMEM-resident
        ],
        out_specs=(
            pl.BlockSpec((TN, V_pad), lambda i: (i, 0)),
            pl.BlockSpec((TN, 1), lambda i: (i, 0)),
        ),
        compiler_params=compiler_params,
    )(idx_flat, tgt_flat, table_pad)

    # Match PyTorch: logits.view(B*T, C) when targets are given.
    logits = logits_pad[:N, :V]
    loss = jnp.sum(row_loss[:N, 0]) / jnp.float32(N)
    return logits, loss


def _reference(idx, table, targets):
    B, T = idx.shape
    V = table.shape[0]
    ref_logits = jnp.take(table, idx.reshape(-1), axis=0)             # (N, V)
    ref_lse = jax.nn.logsumexp(ref_logits, axis=-1)                   # (N,)
    ref_tgt = ref_logits[jnp.arange(B * T), targets.reshape(-1)]      # (N,)
    ref_loss = jnp.mean(ref_lse - ref_tgt)
    return ref_logits, ref_loss


if __name__ == "__main__":
    # Small char-level-style vocab (not a multiple of 128 -> exercises padding).
    B, T, V = 2, 8, 65
    key = jax.random.PRNGKey(0)
    k_table, k_idx, k_tgt, k_idx2, k_tgt2 = jax.random.split(key, 5)

    # nn.Embedding default init: N(0, 1).
    table = jax.random.normal(k_table, (V, V), dtype=jnp.float32)
    idx = jax.random.randint(k_idx, (B, T), 0, V, dtype=jnp.int32)
    targets = jax.random.randint(k_tgt, (B, T), 0, V, dtype=jnp.int32)

    logits, loss = bigram_forward(idx, table, targets)
    logits = jax.block_until_ready(logits)
    loss = jax.block_until_ready(loss)

    ref_logits, ref_loss = _reference(idx, table, targets)
    assert logits.shape == (B * T, V)
    assert jnp.allclose(logits, ref_logits, atol=1e-5)
    assert jnp.allclose(loss, ref_loss, atol=1e-4)

    # No-target (inference) path: logits only, loss is None.
    logits_only, no_loss = bigram_forward(idx, table, None)
    logits_only = jax.block_until_ready(logits_only)
    assert no_loss is None
    assert logits_only.shape == (B, T, V)
    assert jnp.allclose(logits_only.reshape(B * T, V), ref_logits, atol=1e-5)

    # Larger ragged case: multi-tile grid (N = 1200 -> 3 tiles of 512 rows).
    B2, T2 = 4, 300
    idx2 = jax.random.randint(k_idx2, (B2, T2), 0, V, dtype=jnp.int32)
    targets2 = jax.random.randint(k_tgt2, (B2, T2), 0, V, dtype=jnp.int32)
    logits2, loss2 = bigram_forward(idx2, table, targets2)
    logits2 = jax.block_until_ready(logits2)
    loss2 = jax.block_until_ready(loss2)
    ref_logits2, ref_loss2 = _reference(idx2, table, targets2)
    assert logits2.shape == (B2 * T2, V)
    assert jnp.allclose(logits2, ref_logits2, atol=1e-5)
    assert jnp.allclose(loss2, ref_loss2, atol=1e-4)

    # TODO(synk): `generate` uses torch.multinomial sampling in a Python loop;
    # sampling/control flow stays host-side (not implemented as a kernel).

    print("KERNEL_OK")
</pallas_src>

<mosaic_0001>
module attributes {stable_mosaic.version = 11 : i64} {
  func.func @bigram_loss_kernel(%arg0: i32, %arg1: memref<16x1xi32, #tpu.memory_space<vmem>>, %arg2: memref<16x1xi32, #tpu.memory_space<vmem>>, %arg3: memref<128x128xf32, #tpu.memory_space<vmem>>, %arg4: memref<16x128xf32, #tpu.memory_space<vmem>>, %arg5: memref<16x1xf32, #tpu.memory_space<vmem>>) attributes {dimension_semantics = [#tpu.dimension_semantics<parallel>], iteration_bounds = array<i64: 1>, scalar_prefetch = 0 : i64, scratch_operands = 0 : i64, tpu.core_type = #tpu.core_type<tc>, window_params = [{transform_indices = @transform_0, window_bounds = array<i64: 16, 1>}, {transform_indices = @transform_1, window_bounds = array<i64: 16, 1>}, {pipeline_mode = #tpu.pipeline_mode<synchronous>, transform_indices = @transform_2, window_bounds = array<i64: 128, 128>}, {transform_indices = @transform_3, window_bounds = array<i64: 16, 128>}, {transform_indices = @transform_4, window_bounds = array<i64: 16, 1>}]} {
    %c0 = arith.constant 0 : index
    %c0_0 = arith.constant 0 : index
    %0 = vector.load %arg1[%c0, %c0_0] : memref<16x1xi32, #tpu.memory_space<vmem>>, vector<16x1xi32>
    %c0_1 = arith.constant 0 : index
    %c0_2 = arith.constant 0 : index
    %1 = vector.load %arg2[%c0_1, %c0_2] : memref<16x1xi32, #tpu.memory_space<vmem>>, vector<16x1xi32>
    %2 = tpu.iota {dimensions = array<i32: 1>} : vector<16x128xi32>
    %3 = vector.broadcast %0 : vector<16x1xi32> to vector<16x128xi32>
    %4 = arith.cmpi eq, %2, %3 : vector<16x128xi32>
    %5 = arith.extui %4 : vector<16x128xi1> to vector<16x128xi32>
    %6 = arith.sitofp %5 : vector<16x128xi32> to vector<16x128xf32>
    %c0_3 = arith.constant 0 : index
    %c0_4 = arith.constant 0 : index
    %7 = vector.load %arg3[%c0_3, %c0_4] : memref<128x128xf32, #tpu.memory_space<vmem>>, vector<128x128xf32>
    %cst = arith.constant dense<0.000000e+00> : vector<16x128xf32>
    %8 = tpu.matmul %6, %7, %cst {dimension_numbers = #tpu.dot_dimension_numbers<[1], [0], [0], [1], [0, 0, 1, 1], [], []>} : vector<16x128xf32>, vector<128x128xf32>, vector<16x128xf32> -> vector<16x128xf32>
    %c0_5 = arith.constant 0 : index
    %c0_6 = arith.constant 0 : index
    %9 = vector.load %arg4[%c0_5, %c0_6] : memref<16x128xf32, #tpu.memory_space<vmem>>, vector<16x128xf32>
    tpu.vector_store %arg4[%c0_5, %c0_6], %8 {strides = array<i32>} : memref<16x128xf32, #tpu.memory_space<vmem>>, vector<16x128xf32>,
    %cst_7 = arith.constant dense<0xFF800000> : vector<16xf32>
    %10 = vector.multi_reduction <maximumf>, %8, %cst_7 [1] : vector<16x128xf32> to vector<16xf32>
    %11 = vector.shape_cast %10 : vector<16xf32> to vector<16x1xf32>
    %12 = vector.broadcast %11 : vector<16x1xf32> to vector<16x128xf32>
    %13 = arith.subf %8, %12 : vector<16x128xf32>
    %14 = math.exp %13 : vector<16x128xf32>
    %cst_8 = arith.constant dense<0.000000e+00> : vector<16xf32>
    %15 = vector.multi_reduction <add>, %14, %cst_8 [1] : vector<16x128xf32> to vector<16xf32>
    %16 = vector.shape_cast %15 : vector<16xf32> to vector<16x1xf32>
    %17 = math.log %16 : vector<16x1xf32>
    %18 = arith.addf %11, %17 : vector<16x1xf32>
    %19 = vector.broadcast %1 : vector<16x1xi32> to vector<16x128xi32>
    %20 = arith.cmpi eq, %2, %19 : vector<16x128xi32>
    %cst_9 = arith.constant 0.000000e+00 : f32
    %21 = vector.broadcast %cst_9 : f32 to vector<16x128xf32>
    %22 = arith.select %20, %8, %21 : vector<16x128xi1>, vector<16x128xf32>
    %cst_10 = arith.constant dense<0.000000e+00> : vector<16xf32>
    %23 = vector.multi_reduction <add>, %22, %cst_10 [1] : vector<16x128xf32> to vector<16xf32>
    %24 = vector.shape_cast %23 : vector<16xf32> to vector<16x1xf32>
    %25 = arith.subf %18, %24 : vector<16x1xf32>
    %c0_11 = arith.constant 0 : index
    %c0_12 = arith.constant 0 : index
    %26 = vector.load %arg5[%c0_11, %c0_12] : memref<16x1xf32, #tpu.memory_space<vmem>>, vector<16x1xf32>
    tpu.vector_store %arg5[%c0_11, %c0_12], %25 {strides = array<i32>} : memref<16x1xf32, #tpu.memory_space<vmem>>, vector<16x1xf32>,
    return
  }
  func.func @transform_0(%arg0: i32) -> (i32, i32) {
    %c0_i32 = arith.constant 0 : i32
    %c0_i32_0 = arith.constant 0 : i32
    return %arg0, %c0_i32 : i32, i32
  }
  func.func @transform_1(%arg0: i32) -> (i32, i32) {
    %c0_i32 = arith.constant 0 : i32
    %c0_i32_0 = arith.constant 0 : i32
    return %arg0, %c0_i32 : i32, i32
  }
  func.func @transform_2(%arg0: i32) -> (i32, i32) {
    %c0_i32 = arith.constant 0 : i32
    %c0_i32_0 = arith.constant 0 : i32
    %c0_i32_1 = arith.constant 0 : i32
    return %c0_i32, %c0_i32_0 : i32, i32
  }
  func.func @transform_3(%arg0: i32) -> (i32, i32) {
    %c0_i32 = arith.constant 0 : i32
    %c0_i32_0 = arith.constant 0 : i32
    return %arg0, %c0_i32 : i32, i32
  }
  func.func @transform_4(%arg0: i32) -> (i32, i32) {
    %c0_i32 = arith.constant 0 : i32
    %c0_i32_0 = arith.constant 0 : i32
    return %arg0, %c0_i32 : i32, i32
  }
}

</mosaic_0001>

<bundles_post_ra>
// kernel: tpu_custom_call.1
= control target key start
LH: loop header
LB: loop body
LE: loop exit
PB: predicated region body
PF: predicated region fallthrough
CT: control target
= control target key end

     0   :  { %10 = vsyncpa [#allocation3], 0  ;;  %s434_s0 = inlined_call_operand.vmem [shape: s32[16,1], index: 0, kind: input, shape index: {}]   ;;  %s435_s1 = inlined_call_operand.vmem [shape: s32[16,1], index: 1, kind: input, shape index: {}]   ;;  %s436_s2 = inlined_call_operand.hbm [shape: f32[128,128], index: 2, kind: input, shape index: {}]   ;;  %s437_s3 = inlined_call_operand.hbm [shape: f32[16,128], index: 3, kind: output, shape index: {0}]   ;;  %s438_s4 = inlined_call_operand.vmem [shape: f32[16,1], index: 4, kind: output, shape index: {1}]  }
   0x1   :  { %11 = vsyncpa [#allocation4], 0  ;;  %s355_s15 = smov [#allocation2]   ;;  %s307_s19 = scalar_lea.hbm %s436_s2, 2048 }
   0x2   :  { %s21_s16 = sshll.u32 %s355_s15, 4  ;;  %p308_p0 = scmp.ne.s32.totalorder %s436_s2, %s307_s19  ;;  %s22_s16 = int_to_ptr.vmem [resolvable:$true] %s21_s16 }
   0x3   :  { %p311_p1 = scmp.lt.u32.totalorder %s307_s19, %s436_s2 }
   0x5   :  { %p313_p2 = pnand %p311_p1, %p308_p0 }
   0x7   :  { %316 = shalt.err (!%p313_p2)
}
   0x8   :  { %s317_s24 = scalar_lea.vmem %s22_s16, 2048  ;;  %p322_p4 = scmp.lt.s32.totalorder %s22_s16, %s22_s16 }
   0x9   :  { %p318_p3 = scmp.ne.s32.totalorder %s22_s16, %s317_s24  ;;  %p323_p5 = scmp.lt.s32.totalorder %s317_s24, %s317_s24 }
   0xb   :  { %p324_p6 = por %p323_p5, %p322_p4 }
   0xd   :  { %p325_p7 = pnand %p324_p6, %p318_p3 }
   0xf   :  { %328 = shalt.err (!%p325_p7)
}
  0x10   :  { %s356_s25 = smov 128   ;;  %s357_s26 = smov 8  }
  0x11   :  { %27 = dma.hbm_to_vmem [thread:$0]  %s436_s2, 2048, %s22_s16, [#allocation3], %s356_s25, %s356_s25, %s357_s26  }
  0x12   :  { %351 = dma.done.wait [#allocation3], 2048  }
  0x13   :  { %352 = vsyncadd [#allocation3], 4294965248  ;;  %v358_v0 = vmov 0   ;;  %v31_v1 = vld [vmem:[%s434_s0] sm:$0xff]  ;;  %v50_v3 = vld [vmem:[#allocation2 + $0x8] sm:$0xff]  ;;  %v35_v28 = vlaneseq  ;;  %v359_v31 = vmov 1.0  }
  0x14   :  { %297 = vset.pattern.permute.xlu0 %v358_v0  ;;  %298 = vset.pattern.permute.xlu1 %v358_v0  ;;  %v49_v2 = vld [vmem:[#allocation2] sm:$0xff]  ;;  %v51_v4 = vld [vmem:[#allocation2 + $0x10] sm:$0xff]  ;;  %v32_v5 = vld [vmem:[%s434_s0 + $0x8] sm:$0xff] }
  0x15   :  { %38 = vperm.xlu0 %297, %v31_v1   ;;  %v259_v6 = vpack.c.bf16 %v50_v3, %v49_v2  ;;  %v52_v7 = vld [vmem:[#allocation2 + $0x18] sm:$0xff]  ;;  %v53_v9 = vld [vmem:[#allocation2 + $0x20] sm:$0xff]  ;;  %v54_v10 = vld [vmem:[#allocation2 + $0x28] sm:$0xff]  ;;  %v36_v29 = vand.u32 127, %v35_v28 }
  0x16   :  { %v263_v8 = vpack.c.bf16 %v52_v7, %v51_v4  ;;  %v33_v11 = vld [vmem:[%s435_s1] sm:$0xff]  ;;  %v267_v12 = vpack.c.bf16 %v54_v10, %v53_v9  ;;  %v55_v13 = vld [vmem:[#allocation2 + $0x30] sm:$0xff]  ;;  %v56_v14 = vld [vmem:[#allocation2 + $0x38] sm:$0xff] }
  0x17   :  { %260 = vmatprep.subr.bf16.mxu0 %v259_v6  ;;  %v271_v15 = vpack.c.bf16 %v56_v14, %v55_v13  ;;  %v57_v16 = vld [vmem:[#allocation2 + $0x40] sm:$0xff]  ;;  %v58_v17 = vld [vmem:[#allocation2 + $0x48] sm:$0xff]  ;;  %v59_v19 = vld [vmem:[#allocation2 + $0x50] sm:$0xff] }
  0x18   :  { %262 = vmatpush3.bf16.msra.mxu0 %v259_v6  ;;  %v275_v18 = vpack.c.bf16 %v58_v17, %v57_v16  ;;  %v60_v20 = vld [vmem:[#allocation2 + $0x58] sm:$0xff]  ;;  %v61_v22 = vld [vmem:[#allocation2 + $0x60] sm:$0xff]  ;;  %v62_v23 = vld [vmem:[#allocation2 + $0x68] sm:$0xff] }
  0x19   :  { %41 = vperm.xlu0 %297, %v32_v5   ;;  %264 = vmatprep.subr.bf16.mxu0 %v263_v8  ;;  %v279_v21 = vpack.c.bf16 %v60_v20, %v59_v19  ;;  %v283_v24 = vpack.c.bf16 %v62_v23, %v61_v22  ;;  %v63_v25 = vld [vmem:[#allocation2 + $0x70] sm:$0xff]  ;;  %v64_v26 = vld [vmem:[#allocation2 + $0x78] sm:$0xff]  ;;  %v34_v35 = vld [vmem:[%s435_s1 + $0x8] sm:$0xff]  ;;  %s360_s1 = smov [#allocation5]  }
  0x1a   :  { %v287_v27 = vpack.c.bf16 %v64_v26, %v63_v25  ;;  %s186_s9 = sshll.u32 %s360_s1, 4  ;;  %s187_s9 = int_to_ptr.vmem [resolvable:$true] %s186_s9 }
  0x1b   :  { %s329_s10 = scalar_lea.vmem %s187_s9, 256  ;;  %p334_p9 = scmp.lt.s32.totalorder %s187_s9, %s187_s9 }
  0x1c   :  { %266 = vmatpush3.bf16.msra.mxu0 %v263_v8  ;;  %p330_p8 = scmp.ne.s32.totalorder %s187_s9, %s329_s10  ;;  %p335_p10 = scmp.lt.s32.totalorder %s329_s10, %s329_s10 }
  0x1d   :  { %163 = vperm.xlu0 %297, %v33_v11   ;;  %268 = vmatprep.subr.bf16.mxu0 %v267_v12 }
  0x1e   :  { %p336_p11 = por %p335_p10, %p334_p9 }
  0x20   :  { %270 = vmatpush3.bf16.msra.mxu0 %v267_v12  ;;  %p337_p12 = pnand %p336_p11, %p330_p8 }
  0x21   :  { %272 = vmatprep.subr.bf16.mxu0 %v271_v15 }
  0x24   :  { %274 = vmatpush3.bf16.msra.mxu0 %v271_v15 }
  0x25   :  { %276 = vmatprep.subr.bf16.mxu0 %v275_v18 }
  0x28   :  { %278 = vmatpush3.bf16.msra.mxu0 %v275_v18 }
  0x29   :  { %280 = vmatprep.subr.bf16.mxu0 %v279_v21 }
  0x2c   :  { %282 = vmatpush3.bf16.msra.mxu0 %v279_v21 }
  0x2d   :  { %284 = vmatprep.subr.bf16.mxu0 %v283_v24 }
  0x30   :  { %286 = vmatpush3.bf16.msra.mxu0 %v283_v24 }
  0x31   :  { %288 = vmatprep.subr.bf16.mxu0 %v287_v27 }
  0x34   :  { %290 = vmatpush3.bf16.msra.mxu0 %v287_v27 }
  0x94   :  { %v39_v30 = vpop.permute.xlu0 %38 }
  0x95   :  { %vm43_vm0 = vcmp.eq.s32.totalorder %v36_v29, %v39_v30 }
  0x96   :  { %256 = vmatprep.mubr.msk.f32.mxu0 %vm43_vm0, %v359_v31 }
  0x98   :  { %v42_v32 = vpop.permute.xlu0 %41 }
  0x99   :  { %vm44_vm1 = vcmp.eq.s32.totalorder %v36_v29, %v42_v32 }
  0x9a   :  { %257 = vmatmul.mubr.msk.f32.vlgmr.msra.gmra.mrb[0].mxu0 %vm44_vm1, %v359_v31 }
  0x9c   :  { %v164_v44 = vpop.permute.xlu0 %163 }
  0x9d   :  { %vm168_vm2 = vcmp.eq.s32.totalorder %v36_v29, %v164_v44 }
 0x16d   :  { %v258_v33 = vpop.f32.mrb[0].mxu0 }
 0x16e   :  { %141 = vst [vmem:[#allocation5 + $0x8] sm:$0xff] %v258_v33  ;;  %144 = vmax.xlane.f32.xlu1 %v258_v33  ;;  %v131_v34 = vpop.f32.mrb[1].mxu0 }
 0x16f   :  { %140 = vst [vmem:[#allocation5] sm:$0xff] %v131_v34  ;;  %v170_v46 = vsel %vm168_vm2, %v131_v34, 0.0 }
 0x172   :  { %142 = vmax.xlane.f32.xlu1 %v131_v34 }
 0x183   :  { %166 = vperm.xlu1 %298, %v34_v35  }
 0x1fb   :  { %v145_v36 = vpop.xlane.xlu1 %144 }
 0x1fc   :  { %v147_v37 = vsub.f32 %v258_v33, %v145_v36 }
 0x1fe   :  { %v150_v38 = vmul.f32 1.442695, %v147_v37 }
 0x1ff   :  { %v143_v39 = vpop.xlane.xlu1 %142 }
 0x200   :  { %299 = vpow2.f32 %v150_v38  ;;  %v146_v40 = vsub.f32 %v131_v34, %v143_v39 }
 0x202   :  { %v148_v41 = vmul.f32 1.442695, %v146_v40 }
 0x203   :  { %v167_v45 = vpop.permute.xlu1 %166 }
 0x204   :  { %301 = vpow2.f32 %v148_v41  ;;  %vm169_vm3 = vcmp.eq.s32.totalorder %v36_v29, %v167_v45 }
 0x205   :  { %v171_v47 = vsel %vm169_vm3, %v258_v33, 0.0 }
 0x20a   :  { %v300_v42 = vpop.eup %299 }
 0x20b   :  { %154 = vadd.xlane.f32.xlu1 %v300_v42 }
 0x20e   :  { %v302_v43 = vpop.eup %301 }
 0x20f   :  { %152 = vadd.xlane.f32.xlu0 %v302_v43 }
 0x213   :  { %172 = vadd.xlane.f32.xlu0 %v170_v46 }
 0x217   :  { %174 = vadd.xlane.f32.xlu0 %v171_v47 }
 0x218   :  { %340 = shalt.err (!%p337_p12)
}
 0x219   :  { %s341_s13 = scalar_lea.hbm %s437_s3, 256 }
 0x21a   :  { %p342_p13 = scmp.ne.s32.totalorder %s437_s3, %s341_s13  ;;  %p345_p0 = scmp.lt.u32.totalorder %s341_s13, %s437_s3 }
 0x21c   :  { %p347_p1 = pnand %p345_p0, %p342_p13 }
 0x21e   :  { %350 = shalt.err (!%p347_p1)
}
 0x21f   :  { %192 = dma.vmem_to_hbm [thread:$0]  %s187_s9, 256, %s437_s3, [#allocation4], %s356_s25, %s356_s25, %s357_s26   ;;  %vm178_vm4 = vcmask 7168  }
 0x298   :  { %v155_v48 = vpop.xlane.xlu1 %154 }
 0x299   :  { %303 = vlog2.f32 %v155_v48 }
 0x29c   :  { %v153_v49 = vpop.xlane.xlu0 %152 }
 0x29d   :  { %305 = vlog2.f32 %v153_v49 }
 0x2a0   :  { %v173_v50 = vpop.xlane.xlu0 %172 }
 0x2a3   :  { %v304_v51 = vpop.eup %303 }
 0x2a4   :  { %v159_v52 = vmul.f32 0.6931472, %v304_v51  ;;  %v175_v55 = vpop.xlane.xlu0 %174 }
 0x2a6   :  { %v161_v53 = vadd.f32 %v159_v52, %v145_v36 }
 0x2a7   :  { %v306_v54 = vpop.eup %305 }
 0x2a8   :  { %v157_v56 = vmul.f32 0.6931472, %v306_v54  ;;  %v177_v57 = vsub.f32 %v161_v53, %v175_v55 }
 0x2aa   :  { %v160_v58 = vadd.f32 %v157_v56, %v143_v39  ;;  %180 = vst.msk [vmem:[%s438_s4 + $0x8] sm:$0xff] %vm178_vm4, %v177_v57 }
 0x2ac   :  { %v176_v59 = vsub.f32 %v160_v58, %v173_v50 }
 0x2ae   :  { %179 = vst.msk [vmem:[%s438_s4] sm:$0xff] %vm178_vm4, %v176_v59 }
 0x2af   :  { %353 = dma.done.wait [#allocation4], 256  }
 0x2b0   :  { %354 = vsyncadd [#allocation4], 4294967040 }
 0x2b1   :  { %200 = vsyncpa [#allocation3], 1 }
 0x2b2   :  { %201 = vsyncpa [#allocation4], 1 }

</bundles_post_ra>
